<compile_context>
chip_gen: v7x
topology: tpu7x:2x2x1
jax: 0.10.0
libtpu: 0.0.40
codegen_flags: <defaults>
</compile_context>

<pallas_src>
import functools

import jax
import jax.numpy as jnp
from jax.experimental import pallas as pl
from jax.experimental.pallas import tpu as pltpu


def _adapter_kernel(x_ref, w1_ref, b1_ref, w2_ref, b2_ref, out_ref, *aout_refs, eps):
    """One tile of rows [TR, H]: LayerNorm -> bottleneck FFN -> residual add.

    gamma/beta are already fused into w1/b1 by the wrapper, so the kernel only
    does the normalization (mean/var) part of LayerNorm on the VPU. Biases are
    kept in f32; matmul operands use the weight dtype with f32 accumulation.
    """
    xf = x_ref[...].astype(jnp.float32)

    # LayerNorm statistics over the hidden (lane) dim.
    mean = jnp.mean(xf, axis=-1, keepdims=True)
    cent = xf - mean
    var = jnp.mean(cent * cent, axis=-1, keepdims=True)
    nrm = cent * jax.lax.rsqrt(var + eps)

    # Bottleneck feed-forward adapter (H -> M_pad -> H), ReLU in the middle.
    h = jnp.dot(nrm.astype(w1_ref.dtype), w1_ref[...],
                preferred_element_type=jnp.float32)
    h = jnp.maximum(h + b1_ref[...], 0.0)
    a = jnp.dot(h.astype(w2_ref.dtype), w2_ref[...],
                preferred_element_type=jnp.float32)
    a = a + b2_ref[...]

    # Re-read x for the residual so the f32 copy of the tile does not stay live
    # across the two matmuls (less vreg/VMEM-scratch pressure).
    out_ref[...] = (x_ref[...].astype(jnp.float32) + a).astype(out_ref.dtype)
    if aout_refs:
        aout_refs[0][...] = a.astype(aout_refs[0].dtype)


def _vmem_capacity_bytes():
    """Physical VMEM per TensorCore; falls back to the smallest (v7x, 64 MiB)."""
    try:
        info = pltpu.get_tpu_info()
        for attr in ("vmem_capacity_bytes", "vmem_size_bytes", "vmem_bytes"):
            cap = getattr(info, attr, None)
            if cap:
                return int(cap)
    except Exception:
        pass
    return 64 << 20


def _pick_row_tile(rows, H, M_pad, n_outputs, itemsize, weight_bytes,
                   budget_bytes, tile_cap, min_grid_steps=4):
    """Largest row tile whose working set fits the VMEM budget, clamped so the
    grid keeps >= min_grid_steps steps (megacore sharding / pipeline overlap)."""
    # Double-buffered I/O tiles (x + outputs) plus f32 intermediates
    # (nrm [H], h [M_pad], a [H]) that live in vregs / compiler VMEM scratch.
    per_row = 2 * (1 + n_outputs) * H * itemsize
    per_row += (2 * H + M_pad) * 4
    # Constant weights/biases are single-buffered (pl.Buffered(1)).
    avail = max(budget_bytes - weight_bytes, per_row * 8)
    tile = min(tile_cap, rows, max(8, avail // max(per_row, 1)))
    quantum = 16 if itemsize == 2 else 8
    tile = max(quantum, (tile // quantum) * quantum)
    if rows >= min_grid_steps * quantum:
        cap = max(quantum, (rows // min_grid_steps // quantum) * quantum)
        tile = min(tile, cap)
    return int(min(tile, max(rows, quantum)))


def simple_adapter_forward(x, params, *, row_tile=None, eps=1e-6,
                           return_adapter_output=True, mxu_dtype=None):
    """x: [B, L, H] -> (output [B, L, H], adapter_output [B, L, H] or None).

    mxu_dtype: optionally force the matmul/weight dtype (e.g. jnp.bfloat16 when
    stored weights are f32) — halves weight bytes and runs the MXU at full rate.
    Default None keeps the stored weight dtype (exact parity with the reference).
    """
    B, L, H = x.shape
    rows = B * L
    x2 = x.reshape(rows, H)
    # NOTE: for peak utilization H should be a multiple of 128 (lane axis); smaller
    # H still runs correctly (block == full array dim) but underfills vregs.

    gamma = params["gamma"].astype(jnp.float32)
    beta = params["beta"].astype(jnp.float32)
    w1 = params["w1"]                               # [H, M]
    b1 = params["b1"]                               # [M]
    w2 = params["w2"]                               # [M, H]
    M = w1.shape[1]
    wdtype = jnp.dtype(mxu_dtype) if mxu_dtype is not None else w1.dtype

    # Fold the LayerNorm affine into the first projection:
    #   (nrm * gamma + beta) @ W1 + b1 == nrm @ (gamma[:,None] * W1) + (beta @ W1 + b1)
    w1_eff = gamma[:, None] * w1.astype(jnp.float32)
    b1_eff = beta @ w1.astype(jnp.float32) + b1.astype(jnp.float32)
    b2_eff = params["b2"].astype(jnp.float32)

    # Pad the bottleneck dim to a multiple of 128 lanes (zero padding is inert:
    # ReLU(0)=0 and the padded W2 rows are zero). Do NOT pad further than 128.
    M_pad = -(-M // 128) * 128
    w2_f = w2.astype(jnp.float32)
    if M_pad != M:
        w1_eff = jnp.pad(w1_eff, ((0, 0), (0, M_pad - M)))
        b1_eff = jnp.pad(b1_eff, ((0, M_pad - M),))
        w2_f = jnp.pad(w2_f, ((0, M_pad - M), (0, 0)))
    w1_eff = w1_eff.astype(wdtype)                  # MXU operand dtype
    w2_p = w2_f.astype(wdtype)
    b1_eff = b1_eff.reshape(1, M_pad)               # stays f32 (tiny, precise)
    b2_eff = b2_eff.reshape(1, H)                   # stays f32

    n_out = 2 if return_adapter_output else 1
    itemsize = jnp.dtype(x.dtype).itemsize
    widemsize = jnp.dtype(wdtype).itemsize
    weight_bytes = ((H * M_pad + M_pad * H) * widemsize + (M_pad + H) * 4)

    # Generation-aware VMEM sizing: 64 MiB/TC on v7x, 128 MiB on v5e/v6e.
    vmem_cap = _vmem_capacity_bytes()
    vmem_limit = int(min(vmem_cap * 3 // 4, 64 << 20))     # 48 MiB v7x, 64 MiB v5e/v6e
    budget = max(vmem_limit - (8 << 20), 8 << 20)          # leave compiler headroom
    tile_cap = 1024 if vmem_cap >= (96 << 20) else 512

    if row_tile is None:
        row_tile = _pick_row_tile(rows, H, M_pad, n_out, itemsize, weight_bytes,
                                  budget, tile_cap)
    row_tile = int(min(row_tile, rows))
    grid = (pl.cdiv(rows, row_tile),)

    # Constant parameters: block == full array, same block every step -> keep a
    # single resident copy (no second pipeline buffer).
    def const_spec(shp):
        return pl.BlockSpec(shp, lambda i: (0,) * len(shp),
                            pipeline_mode=pl.Buffered(1))

    row_spec = pl.BlockSpec((row_tile, H), lambda i: (i, 0))

    out_shape = tuple(jax.ShapeDtypeStruct((rows, H), x.dtype) for _ in range(n_out))
    out_specs = tuple(pl.BlockSpec((row_tile, H), lambda i: (i, 0)) for _ in range(n_out))

    cost = pl.CostEstimate(
        flops=int(4 * rows * H * M_pad + 8 * rows * H),
        transcendentals=int(rows),
        bytes_accessed=int(rows * H * itemsize * (1 + n_out) + weight_bytes),
    )

    results = pl.pallas_call(
        functools.partial(_adapter_kernel, eps=float(eps)),
        out_shape=out_shape,
        grid_spec=pltpu.PrefetchScalarGridSpec(
            num_scalar_prefetch=0,
            grid=grid,
            in_specs=[
                row_spec,                     # x rows tile (double-buffered)
                const_spec((H, M_pad)),       # w1 (gamma fused), single-buffered
                const_spec((1, M_pad)),       # b1 (beta fused), f32
                const_spec((M_pad, H)),       # w2
                const_spec((1, H)),           # b2, f32
            ],
            out_specs=out_specs,
        ),
        compiler_params=pltpu.CompilerParams(
            dimension_semantics=("parallel",),
            vmem_limit_bytes=vmem_limit,
        ),
        cost_estimate=cost,
    )(x2, w1_eff, b1_eff, w2_p, b2_eff)

    out = results[0].reshape(B, L, H)
    aout = results[1].reshape(B, L, H) if return_adapter_output else None
    return out, aout


def init_params(key, feature_size, memory_count, dtype=jnp.float32):
    """Deterministic synthetic parameters matching FeedForwardAdapterLayer +
    SublayerConnection(LayerNorm) shapes (non-trivial gamma/beta to exercise fusion)."""
    k1, k2, k3, k4 = jax.random.split(key, 4)
    s1 = 1.0 / jnp.sqrt(jnp.asarray(feature_size, jnp.float32))
    s2 = 1.0 / jnp.sqrt(jnp.asarray(memory_count, jnp.float32))
    return {
        "gamma": (1.0 + 0.1 * jax.random.normal(k3, (feature_size,))).astype(dtype),
        "beta": (0.05 * jax.random.normal(k4, (feature_size,))).astype(dtype),
        "w1": (jax.random.uniform(k1, (feature_size, memory_count), jnp.float32,
                                  minval=-1.0, maxval=1.0) * s1).astype(dtype),
        "b1": jnp.zeros((memory_count,), dtype),
        "w2": (jax.random.uniform(k2, (memory_count, feature_size), jnp.float32,
                                  minval=-1.0, maxval=1.0) * s2).astype(dtype),
        "b2": jnp.zeros((feature_size,), dtype),
    }


def mixture_of_adapter_forward(x, target_domain, params_by_domain, *,
                               row_tile=None, eps=1e-6,
                               return_adapter_output=True, mxu_dtype=None):
    """Pallas-backed equivalent of MixtureOfAdapter.forward (mix_output=False)."""
    if target_domain == "news":
        return {"output": x}
    output, adapter_output = simple_adapter_forward(
        x, params_by_domain[target_domain], row_tile=row_tile, eps=eps,
        return_adapter_output=return_adapter_output, mxu_dtype=mxu_dtype)
    if return_adapter_output:
        return {"output": output, "adapter_output": adapter_output}
    return {"output": output}


if __name__ == "__main__":
    key = jax.random.PRNGKey(0)
    kx, kp = jax.random.split(key)

    B, L, H = 2, 8, 32          # x: [B, L, H]
    memory_count = 16           # adapter bottleneck dim ("memory_count")

    x = jax.random.normal(kx, (B, L, H), jnp.float32)
    params = {"book": init_params(kp, H, memory_count)}

    # 'news' passthrough path
    out_news = mixture_of_adapter_forward(x, "news", params)["output"]
    jax.block_until_ready(out_news)

    # 'simple' adapter path (Pallas kernel) — small row tile so the demo grid has
    # multiple steps (pipelining / megacore sharding exercised even at toy shapes).
    res = mixture_of_adapter_forward(x, "book", params, row_tile=8)
    jax.block_until_ready(res["output"])
    jax.block_until_ready(res["adapter_output"])

    # auto-sized tile path (exercises the VMEM-budget / megacore clamp logic)
    res_auto = mixture_of_adapter_forward(x, "book", params)
    jax.block_until_ready(res_auto["output"])

    # output-only variant (drops the adapter_output writeback — preferred on v5e
    # call sites that only consume 'output')
    out_only, _ = simple_adapter_forward(x, params["book"], row_tile=8,
                                         return_adapter_output=False)
    jax.block_until_ready(out_only)

    # lightweight sanity check vs. pure-JAX reference
    # NOTE: eps=1e-6 / biased-variance rsqrt form; see TODO at top if the
    # authoritative SublayerConnection uses the std+eps variant or eps=1e-5.
    p = params["book"]
    xf = x.astype(jnp.float32)
    mu = xf.mean(-1, keepdims=True)
    var = ((xf - mu) ** 2).mean(-1, keepdims=True)
    nrm = (xf - mu) * jax.lax.rsqrt(var + 1e-6) * p["gamma"] + p["beta"]
    h = jnp.maximum(nrm @ p["w1"] + p["b1"], 0.0)
    a_ref = h @ p["w2"] + p["b2"]
    assert jnp.allclose(res["adapter_output"], a_ref, atol=1e-4, rtol=1e-4)
    assert jnp.allclose(res["output"], x + a_ref, atol=1e-4, rtol=1e-4)
    assert jnp.allclose(res_auto["output"], x + a_ref, atol=1e-4, rtol=1e-4)
    assert jnp.allclose(out_only, x + a_ref, atol=1e-4, rtol=1e-4)
    assert jnp.array_equal(out_news, x)

    print("KERNEL_OK")
</pallas_src>

<mosaic_0001>
module attributes {stable_mosaic.version = 11 : i64} {
  func.func @_adapter_kernel(%arg0: i32, %arg1: memref<8x32xf32, #tpu.memory_space<vmem>>, %arg2: memref<32x128xf32, #tpu.memory_space<vmem>>, %arg3: memref<1x128xf32, #tpu.memory_space<vmem>>, %arg4: memref<128x32xf32, #tpu.memory_space<vmem>>, %arg5: memref<1x32xf32, #tpu.memory_space<vmem>>, %arg6: memref<8x32xf32, #tpu.memory_space<vmem>>, %arg7: memref<8x32xf32, #tpu.memory_space<vmem>>) attributes {dimension_semantics = [#tpu.dimension_semantics<parallel>], iteration_bounds = array<i64: 2>, scalar_prefetch = 0 : i64, scratch_operands = 0 : i64, tpu.core_type = #tpu.core_type<tc>, window_params = [{transform_indices = @transform_0, window_bounds = array<i64: 8, 32>}, {pipeline_mode = #tpu.pipeline_mode<synchronous>, transform_indices = @transform_1, window_bounds = array<i64: 32, 128>}, {pipeline_mode = #tpu.pipeline_mode<synchronous>, transform_indices = @transform_2, window_bounds = array<i64: 1, 128>}, {pipeline_mode = #tpu.pipeline_mode<synchronous>, transform_indices = @transform_3, window_bounds = array<i64: 128, 32>}, {pipeline_mode = #tpu.pipeline_mode<synchronous>, transform_indices = @transform_4, window_bounds = array<i64: 1, 32>}, {transform_indices = @transform_5, window_bounds = array<i64: 8, 32>}, {transform_indices = @transform_6, window_bounds = array<i64: 8, 32>}]} {
    %c0 = arith.constant 0 : index
    %c0_0 = arith.constant 0 : index
    %0 = vector.load %arg1[%c0, %c0_0] : memref<8x32xf32, #tpu.memory_space<vmem>>, vector<8x32xf32>
    %cst = arith.constant dense<0.000000e+00> : vector<8xf32>
    %1 = vector.multi_reduction <add>, %0, %cst [1] : vector<8x32xf32> to vector<8xf32>
    %2 = vector.shape_cast %1 : vector<8xf32> to vector<8x1xf32>
    %cst_1 = arith.constant 3.200000e+01 : f32
    %3 = vector.broadcast %cst_1 : f32 to vector<8x1xf32>
    %4 = arith.divf %2, %3 : vector<8x1xf32>
    %5 = vector.broadcast %4 : vector<8x1xf32> to vector<8x32xf32>
    %6 = arith.subf %0, %5 : vector<8x32xf32>
    %7 = arith.mulf %6, %6 : vector<8x32xf32>
    %cst_2 = arith.constant dense<0.000000e+00> : vector<8xf32>
    %8 = vector.multi_reduction <add>, %7, %cst_2 [1] : vector<8x32xf32> to vector<8xf32>
    %9 = vector.shape_cast %8 : vector<8xf32> to vector<8x1xf32>
    %cst_3 = arith.constant 3.200000e+01 : f32
    %10 = vector.broadcast %cst_3 : f32 to vector<8x1xf32>
    %11 = arith.divf %9, %10 : vector<8x1xf32>
    %cst_4 = arith.constant 9.99999997E-7 : f32
    %12 = vector.broadcast %cst_4 : f32 to vector<8x1xf32>
    %13 = arith.addf %11, %12 : vector<8x1xf32>
    %14 = math.rsqrt %13 : vector<8x1xf32>
    %15 = vector.broadcast %14 : vector<8x1xf32> to vector<8x32xf32>
    %16 = arith.mulf %6, %15 : vector<8x32xf32>
    %c0_5 = arith.constant 0 : index
    %c0_6 = arith.constant 0 : index
    %17 = vector.load %arg2[%c0_5, %c0_6] : memref<32x128xf32, #tpu.memory_space<vmem>>, vector<32x128xf32>
    %cst_7 = arith.constant dense<0.000000e+00> : vector<8x128xf32>
    %18 = tpu.matmul %16, %17, %cst_7 {dimension_numbers = #tpu.dot_dimension_numbers<[1], [0], [0], [1], [0, 0, 1, 1], [], []>} : vector<8x32xf32>, vector<32x128xf32>, vector<8x128xf32> -> vector<8x128xf32>
    %c0_8 = arith.constant 0 : index
    %c0_9 = arith.constant 0 : index
    %19 = vector.load %arg3[%c0_8, %c0_9] : memref<1x128xf32, #tpu.memory_space<vmem>>, vector<1x128xf32>
    %20 = vector.broadcast %19 : vector<1x128xf32> to vector<8x128xf32>
    %21 = arith.addf %18, %20 : vector<8x128xf32>
    %cst_10 = arith.constant 0.000000e+00 : f32
    %22 = vector.broadcast %cst_10 : f32 to vector<8x128xf32>
    %23 = arith.maximumf %21, %22 : vector<8x128xf32>
    %c0_11 = arith.constant 0 : index
    %c0_12 = arith.constant 0 : index
    %24 = vector.load %arg4[%c0_11, %c0_12] : memref<128x32xf32, #tpu.memory_space<vmem>>, vector<128x32xf32>
    %cst_13 = arith.constant dense<0.000000e+00> : vector<8x32xf32>
    %25 = tpu.matmul %23, %24, %cst_13 {dimension_numbers = #tpu.dot_dimension_numbers<[1], [0], [0], [1], [0, 0, 1, 1], [], []>} : vector<8x128xf32>, vector<128x32xf32>, vector<8x32xf32> -> vector<8x32xf32>
    %c0_14 = arith.constant 0 : index
    %c0_15 = arith.constant 0 : index
    %26 = vector.load %arg5[%c0_14, %c0_15] : memref<1x32xf32, #tpu.memory_space<vmem>>, vector<1x32xf32>
    %27 = vector.broadcast %26 : vector<1x32xf32> to vector<8x32xf32>
    %28 = arith.addf %25, %27 : vector<8x32xf32>
    %c0_16 = arith.constant 0 : index
    %c0_17 = arith.constant 0 : index
    %29 = vector.load %arg1[%c0_16, %c0_17] : memref<8x32xf32, #tpu.memory_space<vmem>>, vector<8x32xf32>
    %30 = arith.addf %29, %28 : vector<8x32xf32>
    %c0_18 = arith.constant 0 : index
    %c0_19 = arith.constant 0 : index
    %31 = vector.load %arg6[%c0_18, %c0_19] : memref<8x32xf32, #tpu.memory_space<vmem>>, vector<8x32xf32>
    tpu.vector_store %arg6[%c0_18, %c0_19], %30 {strides = array<i32>} : memref<8x32xf32, #tpu.memory_space<vmem>>, vector<8x32xf32>,
    %c0_20 = arith.constant 0 : index
    %c0_21 = arith.constant 0 : index
    %32 = vector.load %arg7[%c0_20, %c0_21] : memref<8x32xf32, #tpu.memory_space<vmem>>, vector<8x32xf32>
    tpu.vector_store %arg7[%c0_20, %c0_21], %28 {strides = array<i32>} : memref<8x32xf32, #tpu.memory_space<vmem>>, vector<8x32xf32>,
    return
  }
  func.func @transform_0(%arg0: i32) -> (i32, i32) {
    %c0_i32 = arith.constant 0 : i32
    %c0_i32_0 = arith.constant 0 : i32
    return %arg0, %c0_i32 : i32, i32
  }
  func.func @transform_1(%arg0: i32) -> (i32, i32) {
    %c0_i32 = arith.constant 0 : i32
    %c0_i32_0 = arith.constant 0 : i32
    %c0_i32_1 = arith.constant 0 : i32
    return %c0_i32, %c0_i32_0 : i32, i32
  }
  func.func @transform_2(%arg0: i32) -> (i32, i32) {
    %c0_i32 = arith.constant 0 : i32
    %c0_i32_0 = arith.constant 0 : i32
    %c0_i32_1 = arith.constant 0 : i32
    return %c0_i32, %c0_i32_0 : i32, i32
  }
  func.func @transform_3(%arg0: i32) -> (i32, i32) {
    %c0_i32 = arith.constant 0 : i32
    %c0_i32_0 = arith.constant 0 : i32
    %c0_i32_1 = arith.constant 0 : i32
    return %c0_i32, %c0_i32_0 : i32, i32
  }
  func.func @transform_4(%arg0: i32) -> (i32, i32) {
    %c0_i32 = arith.constant 0 : i32
    %c0_i32_0 = arith.constant 0 : i32
    %c0_i32_1 = arith.constant 0 : i32
    return %c0_i32, %c0_i32_0 : i32, i32
  }
  func.func @transform_5(%arg0: i32) -> (i32, i32) {
    %c0_i32 = arith.constant 0 : i32
    %c0_i32_0 = arith.constant 0 : i32
    return %arg0, %c0_i32 : i32, i32
  }
  func.func @transform_6(%arg0: i32) -> (i32, i32) {
    %c0_i32 = arith.constant 0 : i32
    %c0_i32_0 = arith.constant 0 : i32
    return %arg0, %c0_i32 : i32, i32
  }
}

</mosaic_0001>

<bundles_post_ra>
// kernel: tpu_custom_call.1
= control target key start
LH: loop header
LB: loop body
LE: loop exit
PB: predicated region body
PF: predicated region fallthrough
CT: control target
= control target key end

     0   :  { %12 = vsyncpa [#allocation3], 0  ;;  %s1090_s0 = inlined_call_operand.vmem [shape: f32[16,32], index: 0, kind: input, shape index: {}]   ;;  %s1091_s1 = inlined_call_operand.vmem [shape: f32[32,128], index: 1, kind: input, shape index: {}]   ;;  %s1092_s2 = inlined_call_operand.vmem [shape: f32[1,128], index: 2, kind: input, shape index: {}]   ;;  %s1093_s3 = inlined_call_operand.vmem [shape: f32[128,32], index: 3, kind: input, shape index: {}]   ;;  %s1094_s4 = inlined_call_operand.vmem [shape: f32[1,32], index: 4, kind: input, shape index: {}]   ;;  %s1095_s5 = inlined_call_operand.hbm [shape: f32[16,32], index: 5, kind: output, shape index: {0}]   ;;  %s1096_s6 = inlined_call_operand.hbm [shape: f32[16,32], index: 6, kind: output, shape index: {1}]  }
   0x1   :  { %14 = vsyncpa [#allocation3 + $0x1], 0 }
   0x2   :  { %15 = vsyncpa [#allocation5], 0 }
   0x3   :  { %17 = vsyncpa [#allocation5 + $0x1], 0  ;;  %s877_s21 = smov 0   ;;  %s879_s22 = smov 0  }
   0x4   :  { %s881_s23 = smov 0   ;;  %s883_s24 = smov 0  }
   0x5 LB: > { %s898_s25 = sadd.s32 4294967295, %s835_s24   ;;  %s578_s26 = sadd.s32 4294967294, %s835_s24   ;;  %s835_s24 = sphi %s883_s24, %s1102_s24   ;;  %s831_s23 = sphi %s881_s23, %s1101_s23   ;;  %s827_s22 = sphi %s879_s22, %s1100_s22   ;;  %s823_s21 = sphi %s877_s21, %s1099_s21  }
   0x6   : > { %s902_s27 = sadd.s32 1, %s835_s24   ;;  %s140_s28 = sadd.s32 1, %s831_s23 }
   0x7   : > { %s137_s29 = ssub.s32 %s835_s24, %s902_s27  ;;  %p150_p0 = scmp.ne.s32.totalorder %s831_s23, %s827_s22 }
   0x8   : > { %p138_p1 = scmp.eq.s32.totalorder %s137_s29, 0  ;;  %p151_p2 = scmp.eq.s32.totalorder %s898_s25, 1 }
   0x9   : > { %p156_p3 = scmp.ne.s32.totalorder %s827_s22, %s823_s21  ;;  %p157_p4 = scmp.eq.s32.totalorder %s578_s26, 1 }
   0xa   : > { %s913_s30 = scalar_select %p138_p1, %s831_s23, %s140_s28  }
   0xb   : > { %p915_p5 = por %p151_p2, %p150_p0  ;;  %p919_p6 = por %p157_p4, %p156_p3 }
   0xc   : > { %p581_p7 = scmp.ge.s32.totalorder %s835_s24, 1  ;;  %p220_p8 = scmp.lt.s32.totalorder %s835_s24, 3 }
   0xe   : > { %p221_p9 = pnand %p581_p7, %p220_p8 }
   0xf   : > { %p254_p10 = scmp.lt.s32.totalorder (!%p221_p9), %s898_s25, 1  ;;  %vm259_vm0 = vcmask (!%p221_p9), 261120   ;;  %v274_v7 = vld [vmem:[%s1091_s1] sm:$0xff] (!%p221_p9)  ;;  %v275_v8 = vld [vmem:[%s1091_s1 + $0x8] sm:$0xff] (!%p221_p9)  ;;  %v276_v9 = vld [vmem:[%s1091_s1 + $0x10] sm:$0xff] (!%p221_p9)  ;;  %v837_v10 = vmov (!%p221_p9), 0.0|0.0  }
  0x10   : > { %224 = sbr.rel (%p221_p9) target bundleno = 804 (0x324), region = 40  ;;  %662 = vmatprep.subr.bf16.mxu0 (!%p221_p9), %v837_v10  ;;  %v663_v11 = vpack.c.bf16 (!%p221_p9), %v275_v8, %v274_v7  ;;  %v277_v12 = vld [vmem:[%s1091_s1 + $0x18] sm:$0xff] (!%p221_p9)  ;;  %vm838_vm1 = vmmov (!%p221_p9), 0   ;;  %v839_v13 = vmov (!%p221_p9), 0.0   ;;  %668 = vmatprep.subr.bf16.mxu1 (!%p221_p9), %v837_v10  ;;  %v359_v15 = vld [vmem:[%s1093_s3] sm:$0xff] (!%p221_p9)  ;;  %v360_v16 = vld [vmem:[%s1093_s3 + $0x8] sm:$0xff] (!%p221_p9) }
  0x11   : > { %624 = vmatprep.mubr.msk.f32.mxu0 (!%p221_p9), %vm838_vm1, %v839_v13  ;;  %659 = vmatprep.mubr.msk.f32.mxu1 (!%p221_p9), %vm838_vm1, %v839_v13  ;;  %v666_v14 = vpack.c.bf16 (!%p221_p9), %v277_v12, %v276_v9  ;;  %v361_v17 = vld [vmem:[%s1093_s3 + $0x10] sm:$0xff] (!%p221_p9)  ;;  %v669_v18 = vpack.c.bf16 (!%p221_p9), %v360_v16, %v359_v15  ;;  %v362_v19 = vld [vmem:[%s1093_s3 + $0x18] sm:$0xff] (!%p221_p9)  ;;  %v363_v21 = vld [vmem:[%s1093_s3 + $0x20] sm:$0xff] (!%p221_p9)  ;;  %s1001_s11 = sand.u32 (!%p221_p9), 1, %s827_s22   ;;  %s590_s15 = sshll.u32 (!%p221_p9), %s898_s25, 7 }
  0x12   : > { %664 = vmatpush3.bf16.msra.mxu0 (!%p221_p9), %v663_v11  ;;  %v672_v20 = vpack.c.bf16 (!%p221_p9), %v362_v19, %v361_v17  ;;  %v364_v22 = vld [vmem:[%s1093_s3 + $0x28] sm:$0xff] (!%p221_p9)  ;;  %v365_v24 = vld [vmem:[%s1093_s3 + $0x30] sm:$0xff] (!%p221_p9)  ;;  %v366_v25 = vld [vmem:[%s1093_s3 + $0x38] sm:$0xff] (!%p221_p9)  ;;  %s582_s12 = sshll.u32 (!%p221_p9), %s1001_s11, 3  ;;  %s1014_s28 = scalar_lea.hbm (!%p221_p9), %s1096_s6, %s590_s15 }
  0x13   : > { %665 = vmatprep.subr.bf16.mxu0 (!%p221_p9), %v837_v10  ;;  %670 = vmatpush3.bf16.msra.mxu1 (!%p221_p9), %v669_v18  ;;  %v675_v23 = vpack.c.bf16 (!%p221_p9), %v364_v22, %v363_v21  ;;  %v678_v26 = vpack.c.bf16 (!%p221_p9), %v366_v25, %v365_v24  ;;  %v367_v27 = vld [vmem:[%s1093_s3 + $0x40] sm:$0xff] (!%p221_p9)  ;;  %v368_v28 = vld [vmem:[%s1093_s3 + $0x48] sm:$0xff] (!%p221_p9)  ;;  %v369_v30 = vld [vmem:[%s1093_s3 + $0x50] sm:$0xff] (!%p221_p9)  ;;  %s253_s16 = scalar_lea.vmem (!%p221_p9), [#allocation4], %s582_s12  ;;  %s1008_s18 = scalar_lea.vmem (!%p221_p9), [#allocation2], %s582_s12 }
  0x14   : > { %671 = vmatprep.subr.bf16.mxu1 (!%p221_p9), %v837_v10  ;;  %v681_v29 = vpack.c.bf16 (!%p221_p9), %v368_v28, %v367_v27  ;;  %v370_v31 = vld [vmem:[%s1093_s3 + $0x58] sm:$0xff] (!%p221_p9)  ;;  %v371_v33 = vld [vmem:[%s1093_s3 + $0x60] sm:$0xff] (!%p221_p9)  ;;  %v372_v34 = vld [vmem:[%s1093_s3 + $0x68] sm:$0xff] (!%p221_p9)  ;;  %s487_s17 = sshll.u32 (!%p221_p9), %s253_s16, 4  ;;  %s474_s19 = sshll.u32 (!%p221_p9), %s1008_s18, 4  ;;  %s1016_s17 = int_to_ptr.vmem [resolvable:$true] %s487_s17  ;;  %s1024_s19 = int_to_ptr.vmem [resolvable:$true] %s474_s19 }
  0x15   : > { %v684_v32 = vpack.c.bf16 (!%p221_p9), %v370_v31, %v369_v30  ;;  %v687_v35 = vpack.c.bf16 (!%p221_p9), %v372_v34, %v371_v33  ;;  %v373_v41 = vld [vmem:[%s1093_s3 + $0x70] sm:$0xff] (!%p221_p9)  ;;  %v374_v42 = vld [vmem:[%s1093_s3 + $0x78] sm:$0xff] (!%p221_p9)  ;;  %v585_v44 = vld [vmem:[%s1092_s2] ss:$0 sm:$0xff] (!%p221_p9)  ;;  %s741_s12 = scalar_lea.vmem (!%p221_p9), %s1016_s17, 128 }
  0x16   : > { %667 = vmatpush3.bf16.msra.mxu0 (!%p221_p9), %v666_v14  ;;  %v690_v43 = vpack.c.bf16 (!%p221_p9), %v374_v42, %v373_v41  ;;  %v587_v49 = vld [vmem:[%s1094_s4] ss:$0 sm:$0xff] (!%p221_p9)  ;;  %p742_p11 = scmp.ne.s32.totalorder (!%p221_p9), %s1016_s17, %s741_s12 }
  0x17   : > { %s255_s9 = scalar_select %p254_p10, %s898_s25, 1  ;;  %673 = vmatpush3.bf16.msra.mxu1 %v672_v20 }
  0x18   : > { %674 = vmatprep.subr.bf16.mxu1 %v837_v10  ;;  %p743_p12 = pnand %p742_p11, %p915_p5 }
  0x19   : > { %s584_s10 = sshll.u32 %s255_s9, 3  ;;  %s1022_s9 = scalar_lea.hbm %s1095_s5, %s590_s15 }
  0x1a   : > { %s257_s13 = scalar_lea.vmem %s1090_s0, %s584_s10  ;;  %s461_s10 = scalar_lea.sflag [#allocation5], %s1001_s11 }
  0x1b   : > { %v930_v0 = vld [vmem:[%s257_s13] sm:$0xff]  ;;  %676 = vmatpush3.bf16.msra.mxu1 %v675_v23  ;;  %p744_p13 = pneg %p743_p12  ;;  %s840_s13 = smov [#allocation4]  }
  0x1c   : > { %v260_v1 = vsel %vm259_vm0, %v930_v0, 0.0  ;;  %677 = vmatprep.subr.bf16.mxu1 %v837_v10  ;;  %s745_s14 = sshll.u32 %s840_s13, 4  ;;  %s746_s14 = int_to_ptr.vmem [resolvable:$false] %s745_s14 }
  0x1d   : > { %261 = vadd.xlane.f32.xlu0 %v260_v1  ;;  %s747_s20 = scalar_lea.vmem %s746_s14, 256  ;;  %p748_p0 = scmp.lt.s32.totalorder %s1016_s17, %s746_s14 }
  0x1e   : > { %p749_p1 = scmp.lt.s32.totalorder %s747_s20, %s741_s12 }
  0x1f   : > { %679 = vmatpush3.bf16.msra.mxu1 %v678_v26 }
  0x20   : > { %680 = vmatprep.subr.bf16.mxu1 %v837_v10  ;;  %p750_p2 = por %p749_p1, %p748_p0 }
  0x22   : > { %p751_p3 = pnand %p750_p2, %p744_p13 }
  0x23   : > { %682 = vmatpush3.bf16.msra.mxu1 %v681_v29 }
  0x24   : > { %683 = vmatprep.subr.bf16.mxu1 %v837_v10 }
  0x27   : > { %685 = vmatpush3.bf16.msra.mxu1 %v684_v32 }
  0x28   : > { %686 = vmatprep.subr.bf16.mxu1 %v837_v10 }
  0x2b   : > { %688 = vmatpush3.bf16.msra.mxu1 %v687_v35 }
  0x2c   : > { %689 = vmatprep.subr.bf16.mxu1 %v837_v10 }
  0x2f   : > { %691 = vmatpush3.bf16.msra.mxu1 %v690_v43 }
  0xaa   : > { %v262_v2 = vpop.xlane.xlu0 %261 }
  0xab   : > { %v264_v3 = vmul.f32 0.03125, %v262_v2 }
  0xad   : > { %v265_v4 = vsub.f32 %v930_v0, %v264_v3 }
  0xaf   : > { %v266_v5 = vmul.f32 %v265_v4, %v265_v4 }
  0xb1   : > { %v267_v6 = vsel %vm259_vm0, %v266_v5, 0.0 }
  0xb2   : > { %268 = vadd.xlane.f32.xlu0 %v267_v6 }
 0x13f   : > { %v269_v36 = vpop.xlane.xlu0 %268 }
 0x140   : > { %v270_v37 = vmul.f32 0.03125, %v269_v36 }
 0x142   : > { %v271_v38 = vadd.f32 1e-06, %v270_v37 }
 0x144   : > { %739 = vrsqrt.f32 %v271_v38 }
 0x14e   : > { %v740_v39 = vpop.eup %739 }
 0x14f   : > { %v273_v40 = vmul.f32 %v740_v39, %v265_v4 }
 0x151   : > { %625 = vmatmul.mubr.msk.f32.vlgmr.msra.gmra.mrb[0].mxu0 %vm259_vm0, %v273_v40 }
 0x224   : > { %v354_v45 = vpop.f32.mrb[0].mxu0 }
 0x225   : > { %v355_v46 = vadd.f32 %v585_v44, %v354_v45  ;;  %v626_v47 = vpop.f32.mrb[1].mxu0 }
 0x227   : > { %v358_v48 = vmax.f32 %v355_v46, 0.0 }
 0x229   : > { %660 = vmatmul.mubr.f32.vlgmr.msra.gmra.mrb[0].mxu1 %v358_v48 }
 0x2fc   : > { %v448_v50 = vpop.f32.mrb[0].mxu1 }
 0x2fd   : > { %v449_v51 = vadd.f32 %v587_v49, %v448_v50  ;;  %v661_v52 = vpop.f32.mrb[1].mxu1 }
 0x2ff   : > { %v452_v53 = vadd.f32 %v449_v51, %v930_v0  ;;  %454 = vst.msk [vmem:[%s253_s16] sm:$0xff] %vm259_vm0, %v449_v51 }
 0x300   : > { %754 = shalt.err (!%p751_p3)
}
 0x301   : > { %s755_s15 = scalar_lea.hbm %s1014_s28, 128  ;;  %s759_s25 = scalar_lea.hbm %s1096_s6, 256 }
 0x302   : > { %p756_p4 = scmp.ne.s32.totalorder %s1014_s28, %s755_s15  ;;  %p760_p9 = scmp.lt.u32.totalorder %s1014_s28, %s1096_s6 }
 0x303   : > { %p761_p10 = scmp.lt.u32.totalorder %s759_s25, %s755_s15  ;;  %p763_p12 = scmp.lt.u32.totalorder %s755_s15, %s1014_s28 }
 0x304   : > { %p757_p7 = pnand %p756_p4, %p915_p5 }
 0x305   : > { %p762_p11 = por %p761_p10, %p760_p9 }
 0x306   : > { %p758_p8 = pneg %p757_p7 }
 0x307   : > { %p764_p13 = por %p763_p12, %p762_p11 }
 0x309   : > { %p765_p0 = pnand %p764_p13, %p758_p8 }
 0x30b   : > { %768 = shalt.err (!%p765_p0)
}
 0x30c   : > { %693 = dma.vmem_to_hbm [thread:$0]  (%p915_p5), %s1016_s17, 128, %s1014_s28, %s461_s10   ;;  %453 = vst.msk [vmem:[%s1008_s18] sm:$0xff] %vm259_vm0, %v452_v53 }
 0x30d   : > { %s456_s12 = scalar_lea.sflag [#allocation3], %s1001_s11  ;;  %s769_s14 = scalar_lea.vmem %s1024_s19, 128 }
 0x30e   : > { %p770_p1 = scmp.ne.s32.totalorder %s1024_s19, %s769_s14  ;;  %s841_s20 = smov [#allocation2]  }
 0x30f   : > { %s773_s15 = sshll.u32 %s841_s20, 4  ;;  %s774_s15 = int_to_ptr.vmem [resolvable:$false] %s773_s15 }
 0x310   : > { %p771_p2 = pnand %p770_p1, %p915_p5  ;;  %s775_s16 = scalar_lea.vmem %s774_s15, 256 }
 0x311   : > { %p776_p4 = scmp.lt.s32.totalorder %s1024_s19, %s774_s15  ;;  %p777_p7 = scmp.lt.s32.totalorder %s775_s16, %s769_s14 }
 0x312   : > { %p772_p3 = pneg %p771_p2 }
 0x313   : > { %p778_p8 = por %p777_p7, %p776_p4 }
 0x315   : > { %p779_p9 = pnand %p778_p8, %p772_p3 }
 0x317   : > { %782 = shalt.err (!%p779_p9)
}
 0x318   : > { %s783_s11 = scalar_lea.hbm %s1022_s9, 128  ;;  %s787_s28 = scalar_lea.hbm %s1095_s5, 256 }
 0x319   : > { %p784_p10 = scmp.ne.s32.totalorder %s1022_s9, %s783_s11  ;;  %p788_p13 = scmp.lt.u32.totalorder %s1022_s9, %s1095_s5 }
 0x31a   : > { %p789_p0 = scmp.lt.u32.totalorder %s787_s28, %s783_s11  ;;  %p791_p2 = scmp.lt.u32.totalorder %s783_s11, %s1022_s9 }
 0x31b   : > { %p785_p11 = pnand %p784_p10, %p915_p5 }
 0x31c   : > { %p790_p1 = por %p789_p0, %p788_p13 }
 0x31d   : > { %p786_p12 = pneg %p785_p11 }
 0x31e   : > { %p792_p3 = por %p791_p2, %p790_p1 }
 0x320   : > { %p793_p4 = pnand %p792_p3, %p786_p12 }
 0x322   : > { %796 = shalt.err (!%p793_p4)
}
 0x323   : > { %692 = dma.vmem_to_hbm [thread:$0]  (%p915_p5), %s1024_s19, 128, %s1022_s9, %s456_s12  }
 0x324 PF: > { %p703_p7 = scmp.ge.s32.totalorder %s835_s24, 2  ;;  %s499_s25 = sand.u32 1, %s823_s21  }
 0x325   : > { %s500_s29 = scalar_lea.sflag [#allocation3], %s499_s25 }
 0x326   : > { %p697_p8 = pnand %p703_p7, %p919_p6 }
 0x328   : > { %814 = dma.done.wait (!%p697_p8), %s500_s29, 128  }
 0x329   : > { %816 = vsyncadd (!%p697_p8), %s500_s29, 4294967168  ;;  %s509_s13 = scalar_lea.sflag [#allocation5], %s499_s25 }
 0x32a   : > { %818 = dma.done.wait (!%p697_p8), %s509_s13, 128  }
 0x32b   : > { %820 = vsyncadd (!%p697_p8), %s509_s13, 4294967168  ;;  %p20_p5 = scmp.ge.s32.totalorder %s902_s27, 4   ;;  %s1099_s21 = smov %s827_s22 }
 0x32c   : > { %s1100_s22 = smov %s831_s23  ;;  %s1101_s23 = smov %s913_s30 }
 0x32d   : > { %s1102_s24 = smov %s902_s27  ;;  %22 = sbr.rel (!%p20_p5) target bundleno = 5 (0x5), region = 92 }
 0x334   :  { %514 = vsyncpa [#allocation3], 1 }
 0x335   :  { %516 = vsyncpa [#allocation3 + $0x1], 1 }
 0x336   :  { %517 = vsyncpa [#allocation5], 1 }
 0x337   :  { %519 = vsyncpa [#allocation5 + $0x1], 1 }

</bundles_post_ra>
